<compile_context>
chip_gen: v6e
topology: v6e:2x2x1
jax: 0.10.0
libtpu: 0.0.40
codegen_flags: <defaults>
</compile_context>

<pallas_src>
import jax
import jax.numpy as jnp
from jax.experimental import pallas as pl
from jax.experimental.pallas import tpu as pltpu

IN_FEATURES = 64
OUT_FEATURES = 10
MAX_TILE_B = 2048            # rows per grid step (multiple of 8)
SINGLE_TILE_MAX_B = 256      # below this, don't bother splitting the batch


def linear_kernel(x_ref, w_ref, b_ref, o_ref):
    # x_ref: (tb, 64), w_ref: (64, 10), b_ref: (1, 10), o_ref: (tb, 10)
    acc = jnp.dot(
        x_ref[...],
        w_ref[...],
        preferred_element_type=jnp.float32,
        precision=jax.lax.Precision.HIGHEST,
    )
    o_ref[...] = (acc + b_ref[...]).astype(o_ref.dtype)


def _cdiv(a, b):
    return -(-a // b)


def _round_up(n, m):
    return _cdiv(n, m) * m


def _choose_tiling(batch):
    """Pick (tile_rows, padded_batch) with <8 wasted rows per tile."""
    b8 = _round_up(max(batch, 1), 8)
    if b8 <= SINGLE_TILE_MAX_B:
        num_tiles = 1
    else:
        # >=2 tiles so dimension_semantics=("parallel",) can use both v7x TCs,
        # and each tile's DMA amortizes the ~0.35us per-step grid overhead.
        num_tiles = max(2, _cdiv(b8, MAX_TILE_B))
    tb = _round_up(_cdiv(b8, num_tiles), 8)
    return tb, tb * num_tiles


def prepare_params(w, b):
    """One-time layout prep (hoisted out of the per-call path).

    w: (10, 64) f32 in PyTorch nn.Linear layout; b: (10,) f32.
    Returns W^T as (64, 10) and bias as a (1, 10) row, both f32 on device.
    """
    w_t = jnp.asarray(jnp.transpose(jnp.asarray(w, jnp.float32)))   # (64, 10)
    b_row = jnp.asarray(b, jnp.float32).reshape(1, OUT_FEATURES)    # (1, 10)
    return w_t, b_row


@jax.jit
def classifier_forward(x, w_t, b_row):
    """x: (B, 64) f32; w_t: (64, 10) f32; b_row: (1, 10) f32 -> (B, 10) f32."""
    batch = x.shape[0]
    tb, padded_b = _choose_tiling(batch)

    x_p = x
    if padded_b != batch:
        x_p = jnp.pad(x, ((0, padded_b - batch), (0, 0)))

    out_padded = pl.pallas_call(
        linear_kernel,
        out_shape=jax.ShapeDtypeStruct((padded_b, OUT_FEATURES), jnp.float32),
        grid_spec=pltpu.PrefetchScalarGridSpec(
            num_scalar_prefetch=0,
            grid=(padded_b // tb,),
            in_specs=[
                pl.BlockSpec((tb, IN_FEATURES), lambda i: (i, 0)),          # x tile
                pl.BlockSpec((IN_FEATURES, OUT_FEATURES), lambda i: (0, 0)),  # W (resident)
                pl.BlockSpec((1, OUT_FEATURES), lambda i: (0, 0)),           # bias (resident)
            ],
            out_specs=pl.BlockSpec((tb, OUT_FEATURES), lambda i: (i, 0)),
        ),
        compiler_params=pltpu.CompilerParams(
            dimension_semantics=("parallel",),  # shard batch tiles across TCs on v7x
        ),
        cost_estimate=pl.CostEstimate(
            flops=2 * padded_b * IN_FEATURES * OUT_FEATURES,
            transcendentals=0,
            bytes_accessed=4 * (padded_b * IN_FEATURES      # x read
                                + IN_FEATURES * OUT_FEATURES  # W read
                                + OUT_FEATURES                # bias read
                                + padded_b * OUT_FEATURES),   # out write
        ),
    )(x_p, w_t, b_row)

    if padded_b != batch:
        return out_padded[:batch]
    return out_padded


def init_params(key):
    # nn.Linear default init: U(-1/sqrt(in), 1/sqrt(in)) for weight and bias.
    kw, kb = jax.random.split(key)
    bound = 1.0 / jnp.sqrt(jnp.float32(IN_FEATURES))
    w = jax.random.uniform(kw, (OUT_FEATURES, IN_FEATURES), jnp.float32,
                           minval=-bound, maxval=bound)
    b = jax.random.uniform(kb, (OUT_FEATURES,), jnp.float32,
                           minval=-bound, maxval=bound)
    return w, b


if __name__ == "__main__":
    key = jax.random.PRNGKey(0)
    kparams, kx = jax.random.split(key)
    w, b = init_params(kparams)
    w_t, b_row = prepare_params(w, b)   # one-time layout prep, outside jit

    B = 8
    x = jax.random.normal(kx, (B, IN_FEATURES), jnp.float32)

    out = classifier_forward(x, w_t, b_row)
    jax.block_until_ready(out)

    # Correctness check against plain JAX reference.
    ref = x @ w.T + b
    assert out.shape == (B, OUT_FEATURES)
    assert jnp.allclose(out, ref, atol=1e-5, rtol=1e-5)
    print("KERNEL_OK")
</pallas_src>

<mosaic_0001>
module attributes {stable_mosaic.version = 11 : i64} {
  func.func @linear_kernel(%arg0: i32, %arg1: memref<8x64xf32, #tpu.memory_space<vmem>>, %arg2: memref<64x10xf32, #tpu.memory_space<vmem>>, %arg3: memref<1x10xf32, #tpu.memory_space<vmem>>, %arg4: memref<8x10xf32, #tpu.memory_space<vmem>>) attributes {dimension_semantics = [#tpu.dimension_semantics<parallel>], iteration_bounds = array<i64: 1>, scalar_prefetch = 0 : i64, scratch_operands = 0 : i64, tpu.core_type = #tpu.core_type<tc>, window_params = [{transform_indices = @transform_0, window_bounds = array<i64: 8, 64>}, {pipeline_mode = #tpu.pipeline_mode<synchronous>, transform_indices = @transform_1, window_bounds = array<i64: 64, 10>}, {pipeline_mode = #tpu.pipeline_mode<synchronous>, transform_indices = @transform_2, window_bounds = array<i64: 1, 10>}, {transform_indices = @transform_3, window_bounds = array<i64: 8, 10>}]} {
    %c0 = arith.constant 0 : index
    %c0_0 = arith.constant 0 : index
    %0 = vector.load %arg1[%c0, %c0_0] : memref<8x64xf32, #tpu.memory_space<vmem>>, vector<8x64xf32>
    %c0_1 = arith.constant 0 : index
    %c0_2 = arith.constant 0 : index
    %1 = vector.load %arg2[%c0_1, %c0_2] : memref<64x10xf32, #tpu.memory_space<vmem>>, vector<64x10xf32>
    %cst = arith.constant dense<0.000000e+00> : vector<8x10xf32>
    %2 = tpu.matmul %0, %1, %cst {dimension_numbers = #tpu.dot_dimension_numbers<[1], [0], [0], [1], [0, 0, 1, 1], [], []>, precision = #tpu.contract_precision<fp32>} : vector<8x64xf32>, vector<64x10xf32>, vector<8x10xf32> -> vector<8x10xf32>
    %c0_3 = arith.constant 0 : index
    %c0_4 = arith.constant 0 : index
    %3 = vector.load %arg3[%c0_3, %c0_4] : memref<1x10xf32, #tpu.memory_space<vmem>>, vector<1x10xf32>
    %4 = vector.broadcast %3 : vector<1x10xf32> to vector<8x10xf32>
    %5 = arith.addf %2, %4 : vector<8x10xf32>
    %c0_5 = arith.constant 0 : index
    %c0_6 = arith.constant 0 : index
    %6 = vector.load %arg4[%c0_5, %c0_6] : memref<8x10xf32, #tpu.memory_space<vmem>>, vector<8x10xf32>
    tpu.vector_store %arg4[%c0_5, %c0_6], %5 {strides = array<i32>} : memref<8x10xf32, #tpu.memory_space<vmem>>, vector<8x10xf32>,
    return
  }
  func.func @transform_0(%arg0: i32) -> (i32, i32) {
    %c0_i32 = arith.constant 0 : i32
    %c0_i32_0 = arith.constant 0 : i32
    return %arg0, %c0_i32 : i32, i32
  }
  func.func @transform_1(%arg0: i32) -> (i32, i32) {
    %c0_i32 = arith.constant 0 : i32
    %c0_i32_0 = arith.constant 0 : i32
    %c0_i32_1 = arith.constant 0 : i32
    return %c0_i32, %c0_i32_0 : i32, i32
  }
  func.func @transform_2(%arg0: i32) -> (i32, i32) {
    %c0_i32 = arith.constant 0 : i32
    %c0_i32_0 = arith.constant 0 : i32
    %c0_i32_1 = arith.constant 0 : i32
    return %c0_i32, %c0_i32_0 : i32, i32
  }
  func.func @transform_3(%arg0: i32) -> (i32, i32) {
    %c0_i32 = arith.constant 0 : i32
    %c0_i32_0 = arith.constant 0 : i32
    return %arg0, %c0_i32 : i32, i32
  }
}

</mosaic_0001>

<bundles_post_ra>
// kernel: classifier_forward.1
= control target key start
LH: loop header
LB: loop body
LE: loop exit
PB: predicated region body
PF: predicated region fallthrough
CT: control target
= control target key end

     0   :  { %vm31_vm0 = vcmask 523264   ;;  %v782_v3 = vmov 0.0   ;;  %vm783_vm1 = vmmov 0   ;;  %s1034_s0 = inlined_call_operand.vmem [shape: f32[8,64], index: 0, kind: input, shape index: {}]   ;;  %s1035_s1 = inlined_call_operand.vmem [shape: f32[64,10], index: 1, kind: input, shape index: {}]   ;;  %s1036_s2 = inlined_call_operand.vmem [shape: f32[1,10], index: 2, kind: input, shape index: {}]   ;;  %s1037_s3 = inlined_call_operand.hbm [shape: f32[8,10], index: 3, kind: output, shape index: {}]  }
   0x1   :  { %v23_v0 = vld [vmem:[%s1035_s1 + $0x38] sm:$0xff]  ;;  %v22_v1 = vld [vmem:[%s1035_s1 + $0x30] sm:$0xff]  ;;  %v21_v2 = vld [vmem:[%s1035_s1 + $0x28] sm:$0xff]  ;;  %643 = vmatprep.subr.mxu0 %v782_v3  ;;  %662 = vmatprep.subr.mxu1 %v782_v3 }
   0x2   :  { %v815_v4 = vand.u32 4294901760, %v23_v0  ;;  %v817_v5 = vand.u32 4294901760, %v22_v1  ;;  %v819_v6 = vand.u32 4294901760, %v21_v2  ;;  %v20_v7 = vld [vmem:[%s1035_s1 + $0x20] sm:$0xff]  ;;  %v19_v8 = vld [vmem:[%s1035_s1 + $0x18] sm:$0xff]  ;;  %v18_v9 = vld [vmem:[%s1035_s1 + $0x10] sm:$0xff]  ;;  %659 = vmatprep.mubr.msk.f32.mxu0 %vm783_vm1, %v782_v3  ;;  %678 = vmatprep.mubr.msk.f32.mxu1 %vm783_vm1, %v782_v3 }
   0x3   :  { %v831_v10 = vand.u32 4294901760, %v20_v7  ;;  %v833_v11 = vand.u32 4294901760, %v19_v8  ;;  %v835_v12 = vand.u32 4294901760, %v18_v9  ;;  %v17_v13 = vld [vmem:[%s1035_s1 + $0x8] sm:$0xff]  ;;  %v16_v14 = vld [vmem:[%s1035_s1] sm:$0xff] }
   0x4   :  { %v15_v15 = vld [vmem:[%s1034_s0] sm:$0xff]  ;;  %644 = vmatpush3.msra.mxu0 %v815_v4  ;;  %v852_v16 = vsub.f32 %v23_v0, %v815_v4  ;;  %v855_v17 = vsub.f32 %v22_v1, %v817_v5  ;;  %v857_v18 = vand.u32 4294901760, %v17_v13  ;;  %v860_v19 = vsub.f32 %v21_v2, %v819_v6 }
   0x5   :  { %8 = vsyncpa [#allocation3], 0  ;;  %645 = vmatprep.subr.mxu0 %v782_v3  ;;  %v863_v20 = vand.u32 4294901760, %v16_v14  ;;  %v866_v21 = vsub.f32 %v20_v7, %v831_v10  ;;  %v33_v22 = vsel %vm31_vm0, %v15_v15, 0  ;;  %v870_v23 = vsub.f32 %v19_v8, %v833_v11  ;;  %v588_v0 = vld [vmem:[%s1036_s2] ss:$0 sm:$0xff] }
   0x6   :  { %646 = vmatpush3.msra.mxu0 %v817_v5  ;;  %v137_v24 = vand.u32 4294901760, %v852_v16  ;;  %v144_v25 = vand.u32 4294901760, %v855_v17  ;;  %v151_v26 = vand.u32 4294901760, %v860_v19  ;;  %v876_v27 = vand.u32 4294901760, %v33_v22  ;;  %s784_s30 = smov [#allocation2]  }
   0x7   :  { %647 = vmatprep.subr.mxu0 %v782_v3  ;;  %v158_v28 = vand.u32 4294901760, %v866_v21  ;;  %v165_v29 = vand.u32 4294901760, %v870_v23  ;;  %v882_v30 = vsub.f32 %v18_v9, %v835_v12  ;;  %v885_v31 = vsub.f32 %v17_v13, %v857_v18  ;;  %s580_s4 = sshll.u32 %s784_s30, 4  ;;  %s581_s4 = int_to_ptr.vmem [resolvable:$true] %s580_s4 }
   0x8   :  { %648 = vmatpush3.msra.mxu0 %v819_v6  ;;  %v138_v32 = vsub.f32 %v852_v16, %v137_v24  ;;  %v145_v33 = vsub.f32 %v855_v17, %v144_v25  ;;  %v152_v34 = vsub.f32 %v860_v19, %v151_v26  ;;  %v898_v35 = vsub.f32 %v33_v22, %v876_v27  ;;  %s760_s5 = scalar_lea.vmem %s581_s4, 128  ;;  %p765_p1 = scmp.lt.s32.totalorder %s581_s4, %s581_s4 }
   0x9   :  { %649 = vmatprep.subr.mxu0 %v782_v3  ;;  %v159_v36 = vsub.f32 %v866_v21, %v158_v28  ;;  %v172_v40 = vand.u32 4294901760, %v882_v30  ;;  %v166_v41 = vsub.f32 %v870_v23, %v165_v29  ;;  %v179_v44 = vand.u32 4294901760, %v885_v31  ;;  %p761_p0 = scmp.ne.s32.totalorder %s581_s4, %s760_s5  ;;  %p766_p2 = scmp.lt.s32.totalorder %s760_s5, %s760_s5 }
   0xa   :  { %650 = vmatpush3.msra.mxu0 %v831_v10  ;;  %v139_v37 = vand.u32 4294901760, %v138_v32  ;;  %v146_v38 = vand.u32 4294901760, %v145_v33  ;;  %v110_v39 = vand.u32 4294901760, %v898_v35  ;;  %v153_v42 = vand.u32 4294901760, %v152_v34 }
   0xb   :  { %651 = vmatprep.subr.mxu0 %v782_v3  ;;  %v917_v45 = vsub.f32 %v16_v14, %v863_v20  ;;  %v160_v46 = vand.u32 4294901760, %v159_v36  ;;  %v173_v47 = vsub.f32 %v882_v30, %v172_v40  ;;  %v167_v50 = vand.u32 4294901760, %v166_v41  ;;  %p767_p3 = por %p766_p2, %p765_p1 }
   0xc   :  { %652 = vmatpush3.msra.mxu0 %v833_v11  ;;  %663 = vmatpush3.msra.mxu1 %v139_v37  ;;  %v111_v43 = vsub.f32 %v898_v35, %v110_v39  ;;  %v180_v51 = vsub.f32 %v885_v31, %v179_v44  ;;  %vm572_vm2 = vcmask 80896  }
   0xd   :  { %653 = vmatprep.subr.mxu0 %v782_v3  ;;  %664 = vmatprep.subr.mxu1 %v782_v3  ;;  %v186_v48 = vand.u32 4294901760, %v917_v45  ;;  %v174_v52 = vand.u32 4294901760, %v173_v47  ;;  %p768_p4 = pnand %p767_p3, %p761_p0 }
   0xe   :  { %654 = vmatpush3.msra.mxu0 %v835_v12  ;;  %665 = vmatpush3.msra.mxu1 %v146_v38  ;;  %v112_v49 = vand.u32 4294901760, %v111_v43  ;;  %v181_v54 = vand.u32 4294901760, %v180_v51 }
   0xf   :  { %655 = vmatprep.subr.mxu0 %v782_v3  ;;  %666 = vmatprep.subr.mxu1 %v782_v3  ;;  %v187_v53 = vsub.f32 %v917_v45, %v186_v48 }
  0x10   :  { %656 = vmatpush3.msra.mxu0 %v857_v18  ;;  %667 = vmatpush3.msra.mxu1 %v153_v42 }
  0x11   :  { %657 = vmatprep.subr.mxu0 %v782_v3  ;;  %668 = vmatprep.subr.mxu1 %v782_v3  ;;  %v188_v55 = vand.u32 4294901760, %v187_v53 }
  0x12   :  { %658 = vmatpush3.msra.mxu0 %v863_v20  ;;  %669 = vmatpush3.msra.mxu1 %v160_v46 }
  0x13   :  { %670 = vmatprep.subr.mxu1 %v782_v3  ;;  %681 = vmatprep.subr.mxu0 %v782_v3 }
  0x14   :  { %660 = vmatmul.mubr.f32.vlgmr.msra.gmra.mxu0 %v112_v49  ;;  %671 = vmatpush3.msra.mxu1 %v167_v50 }
  0x15   :  { %682 = vmatpush3.msra.mxu0 %v852_v16  ;;  %672 = vmatprep.subr.mxu1 %v782_v3 }
  0x16   :  { %683 = vmatprep.subr.mxu0 %v782_v3  ;;  %673 = vmatpush3.msra.mxu1 %v174_v52 }
  0x17   :  { %684 = vmatpush3.msra.mxu0 %v855_v17  ;;  %674 = vmatprep.subr.mxu1 %v782_v3 }
  0x18   :  { %685 = vmatprep.subr.mxu0 %v782_v3  ;;  %675 = vmatpush3.msra.mxu1 %v181_v54 }
  0x19   :  { %686 = vmatpush3.msra.mxu0 %v860_v19  ;;  %676 = vmatprep.subr.mxu1 %v782_v3 }
  0x1a   :  { %687 = vmatprep.subr.mxu0 %v782_v3  ;;  %677 = vmatpush3.msra.mxu1 %v188_v55 }
  0x1b   :  { %688 = vmatpush3.msra.mxu0 %v866_v21  ;;  %679 = vmatmul.mubr.f32.vlgmr.msra.gmra.mxu1 %v876_v27 }
  0x1c   :  { %689 = vmatprep.subr.mxu0 %v782_v3  ;;  %700 = vmatprep.subr.mxu1 %v782_v3 }
  0x1d   :  { %690 = vmatpush3.msra.mxu0 %v870_v23  ;;  %701 = vmatpush3.msra.mxu1 %v815_v4 }
  0x1e   :  { %691 = vmatprep.subr.mxu0 %v782_v3  ;;  %702 = vmatprep.subr.mxu1 %v782_v3 }
  0x1f   :  { %692 = vmatpush3.msra.mxu0 %v882_v30  ;;  %703 = vmatpush3.msra.mxu1 %v817_v5 }
  0x20   :  { %693 = vmatprep.subr.mxu0 %v782_v3  ;;  %704 = vmatprep.subr.mxu1 %v782_v3 }
  0x21   :  { %694 = vmatpush3.msra.mxu0 %v885_v31  ;;  %705 = vmatpush3.msra.mxu1 %v819_v6 }
  0x22   :  { %695 = vmatprep.subr.mxu0 %v782_v3  ;;  %706 = vmatprep.subr.mxu1 %v782_v3 }
  0x23   :  { %696 = vmatpush3.msra.mxu0 %v917_v45  ;;  %697 = vmatprep.mubr.msk.f32.mxu0 %vm783_vm1, %v782_v3 }
  0x24   :  { %707 = vmatpush3.msra.mxu1 %v831_v10  ;;  %698 = vmatmul.mubr.f32.vlgmr.msra.gmra.mxu0 %v898_v35 }
  0x25   :  { %708 = vmatprep.subr.mxu1 %v782_v3  ;;  %719 = vmatprep.subr.mxu0 %v782_v3 }
  0x26   :  { %709 = vmatpush3.msra.mxu1 %v833_v11  ;;  %720 = vmatpush3.msra.mxu0 %v137_v24 }
  0x27   :  { %710 = vmatprep.subr.mxu1 %v782_v3  ;;  %721 = vmatprep.subr.mxu0 %v782_v3 }
  0x28   :  { %711 = vmatpush3.msra.mxu1 %v835_v12  ;;  %722 = vmatpush3.msra.mxu0 %v144_v25 }
  0x29   :  { %712 = vmatprep.subr.mxu1 %v782_v3  ;;  %723 = vmatprep.subr.mxu0 %v782_v3 }
  0x2a   :  { %713 = vmatpush3.msra.mxu1 %v857_v18  ;;  %724 = vmatpush3.msra.mxu0 %v151_v26 }
  0x2b   :  { %714 = vmatprep.subr.mxu1 %v782_v3  ;;  %725 = vmatprep.subr.mxu0 %v782_v3 }
  0x2c   :  { %715 = vmatpush3.msra.mxu1 %v863_v20  ;;  %716 = vmatprep.mubr.msk.f32.mxu1 %vm783_vm1, %v782_v3 }
  0x2d   :  { %726 = vmatpush3.msra.mxu0 %v158_v28  ;;  %717 = vmatmul.mubr.f32.vlgmr.msra.gmra.mxu1 %v110_v39 }
  0x2e   :  { %727 = vmatprep.subr.mxu0 %v782_v3  ;;  %738 = vmatprep.subr.mxu1 %v782_v3 }
  0x2f   :  { %728 = vmatpush3.msra.mxu0 %v165_v29  ;;  %739 = vmatpush3.msra.mxu1 %v815_v4 }
  0x30   :  { %729 = vmatprep.subr.mxu0 %v782_v3  ;;  %740 = vmatprep.subr.mxu1 %v782_v3 }
  0x31   :  { %730 = vmatpush3.msra.mxu0 %v172_v40  ;;  %741 = vmatpush3.msra.mxu1 %v817_v5 }
  0x32   :  { %731 = vmatprep.subr.mxu0 %v782_v3  ;;  %742 = vmatprep.subr.mxu1 %v782_v3 }
  0x33   :  { %732 = vmatpush3.msra.mxu0 %v179_v44  ;;  %743 = vmatpush3.msra.mxu1 %v819_v6 }
  0x34   :  { %733 = vmatprep.subr.mxu0 %v782_v3  ;;  %744 = vmatprep.subr.mxu1 %v782_v3 }
  0x35   :  { %734 = vmatpush3.msra.mxu0 %v186_v48  ;;  %735 = vmatprep.mubr.msk.f32.mxu0 %vm783_vm1, %v782_v3 }
  0x36   :  { %745 = vmatpush3.msra.mxu1 %v831_v10  ;;  %736 = vmatmul.mubr.f32.vlgmr.msra.gmra.mxu0 %v876_v27 }
  0x37   :  { %746 = vmatprep.subr.mxu1 %v782_v3  ;;  %754 = vmatprep.mubr.msk.f32.mxu1 %vm783_vm1, %v782_v3 }
  0x38   :  { %747 = vmatpush3.msra.mxu1 %v833_v11 }
  0x39   :  { %748 = vmatprep.subr.mxu1 %v782_v3 }
  0x3a   :  { %749 = vmatpush3.msra.mxu1 %v835_v12 }
  0x3b   :  { %750 = vmatprep.subr.mxu1 %v782_v3 }
  0x3c   :  { %751 = vmatpush3.msra.mxu1 %v857_v18 }
  0x3d   :  { %752 = vmatprep.subr.mxu1 %v782_v3 }
  0x3e   :  { %753 = vmatpush3.msra.mxu1 %v863_v20 }
  0x3f   :  { %755 = vmatmul.mubr.f32.vlgmr.msra.gmra.mxu1 %v876_v27 }
  0xd4   :  { %v114_v56 = vpop.f32.mrf.mxu0 }
  0xd5   :  { %v115_v1 = vadd.f32 %v588_v0, %v114_v56 }
  0xd6   :  { %v661_v57 = vpop.f32.mrf.mxu0 }
  0xdb   :  { %v225_v58 = vpop.f32.mrf.mxu1 }
  0xdc   :  { %v226_v4 = vadd.f32 %v225_v58, %v115_v1 }
  0xdd   :  { %v680_v59 = vpop.f32.mrf.mxu1 }
  0xe4   :  { %v313_v60 = vpop.f32.mrf.mxu0 }
  0xe5   :  { %v314_v5 = vadd.f32 %v313_v60, %v226_v4 }
  0xe6   :  { %v699_v61 = vpop.f32.mrf.mxu0 }
  0xed   :  { %v394_v62 = vpop.f32.mrf.mxu1 }
  0xee   :  { %v395_v6 = vadd.f32 %v394_v62, %v314_v5 }
  0xef   :  { %v718_v63 = vpop.f32.mrf.mxu1 }
  0xf6   :  { %v489_v2 = vpop.f32.mrf.mxu0 }
  0xf7   :  { %v490_v7 = vadd.f32 %v489_v2, %v395_v6 }
  0xf8   :  { %v737_v3 = vpop.f32.mrf.mxu0 }
  0xff   :  { %v568_v8 = vpop.f32.mrf.mxu1 }
 0x100   :  { %v569_v9 = vadd.f32 %v568_v8, %v490_v7 }
 0x101   :  { %v756_v10 = vpop.f32.mrf.mxu1 }
 0x102   :  { %573 = vst.msk [vmem:[#allocation2] sm:$0xff] %vm572_vm2, %v569_v9 }
 0x103   :  { %771 = shalt.err (!%p768_p4)
}
 0x104   :  { %583 = dma.vmem_to_hbm [thread:$0]  %s581_s4, 128, %s1037_s3, [#allocation3]  }
 0x105   :  { %780 = dma.done.wait [#allocation3], 128  }
 0x106   :  { %781 = vsyncadd [#allocation3], 4294967168 }
 0x107   :  { %587 = vsyncpa [#allocation3], 1 }

</bundles_post_ra>
